<compile_context>
chip_gen: v6e
topology: v6e:2x2x1
jax: 0.10.0
libtpu: 0.0.40
codegen_flags: <defaults>
</compile_context>

<pallas_src>
import math
import functools

import jax
import jax.numpy as jnp
from jax.experimental import pallas as pl
from jax.experimental.pallas import tpu as pltpu


def _round_up(x, m):
    return (x + m - 1) // m * m


_TB_MAX = 256                          # max batch rows resident per grid step
_VMEM_TILE_BUDGET = 20 * 1024 * 1024   # conservative tile budget (v7x-safe)
_VMEM_LIMIT = 32 * 1024 * 1024         # scoped VMEM limit handed to Mosaic


def _choose_tn(nc, dim_pad, half_pad, H_pad, budget):
    """Largest w2 column tile (multiple of 128) whose working set fits VMEM."""
    fixed = (2 * nc * dim_pad * H_pad * 2     # w1  (bf16, double-buffered)
             + 2 * H_pad * 4                  # b1  (f32)
             + 2 * half_pad * 4               # freqs
             + 2 * _TB_MAX * max(nc, 1) * 4   # t
             + _TB_MAX * H_pad * 2            # h scratch (bf16)
             + _TB_MAX * H_pad * 4)           # live f32 accumulator
    tn = H_pad
    while tn > 128:
        per_tile = (2 * H_pad * tn * 2        # w2 tile (bf16, double-buffered)
                    + 2 * tn * 4              # b2 tile
                    + 2 * _TB_MAX * tn * 4)   # output tile (f32, double-buffered)
        if fixed + per_tile <= budget:
            break
        tn -= 128
    return max(tn, 128)


def _timestep_embedder_kernel(t_ref, freqs_ref, w1_ref, b1_ref, w2_ref, b2_ref,
                              o_ref, h_ref, *, num_conds, half_pad):
    """Grid = (batch blocks, w2 column tiles); column axis iterates fastest.

    t_ref:     (TB, nc)              f32   per batch block
    freqs_ref: (1, half_pad)         f32   resident
    w1_ref:    (nc*2*half_pad, H_pad) bf16 resident
    b1_ref:    (1, H_pad)            f32   resident
    w2_ref:    (H_pad, TN)           bf16  streamed column tile
    b2_ref:    (1, TN)               f32   streamed column tile
    o_ref:     (TB, TN)              f32   output tile
    h_ref:     (TB, H_pad)           bf16  VMEM scratch (hidden activations)
    """
    @pl.when(pl.program_id(1) == 0)
    def _compute_hidden():
        t = t_ref[...]                       # (TB, nc) f32
        freqs = freqs_ref[...]               # (1, half_pad) f32
        dim_pad = 2 * half_pad
        acc = jnp.zeros((t_ref.shape[0], w1_ref.shape[1]), jnp.float32)
        # Per-cond partial matmuls against static row slices of w1
        # (cos rows, then sin rows) -- no in-kernel concatenate needed.
        for c in range(num_conds):           # static & tiny
            args = t[:, c:c + 1] * freqs     # (TB, half_pad)
            r0 = c * dim_pad                 # static offsets -> free ref views
            acc = acc + jnp.dot(jnp.cos(args).astype(w1_ref.dtype),
                                w1_ref[r0:r0 + half_pad, :],
                                preferred_element_type=jnp.float32)
            acc = acc + jnp.dot(jnp.sin(args).astype(w1_ref.dtype),
                                w1_ref[r0 + half_pad:r0 + dim_pad, :],
                                preferred_element_type=jnp.float32)
        h = acc + b1_ref[...]
        h = h * jax.nn.sigmoid(h)            # SiLU; sigmoid -> EUP slot
        h_ref[...] = h.astype(h_ref.dtype)   # bf16 MXU operand for layer 2

    out = jnp.dot(h_ref[...], w2_ref[...],
                  preferred_element_type=jnp.float32) + b2_ref[...]
    o_ref[...] = out.astype(o_ref.dtype)


def make_timestep_embedder_fn(freqs, w1, b1, w2, b2, *, num_conds):
    """One-time parameter prep (padding / re-layout / dtype casts) done here,
    OUTSIDE the per-call hot path.  Returns a jitted forward(t) -> (B, H)."""
    half = int(freqs.shape[-1])
    dim = 2 * half
    in_dim, H = w1.shape
    assert in_dim == num_conds * dim and w2.shape == (H, H)

    half_pad = _round_up(half, 128)
    dim_pad = 2 * half_pad
    H_pad = _round_up(H, 128)

    tn = _choose_tn(num_conds, dim_pad, half_pad, H_pad, _VMEM_TILE_BUDGET)
    nt = (H_pad + tn - 1) // tn
    N_pad = nt * tn                           # padded output-column extent

    # --- one-time padded / re-laid-out parameters ---
    freqs_p = jnp.zeros((1, half_pad), jnp.float32).at[:, :half].set(
        jnp.asarray(freqs, jnp.float32).reshape(1, half))

    # Row layout of w1 per cond c: [cos rows | zero pad | sin rows | zero pad].
    w1_bf = jnp.asarray(w1, jnp.bfloat16)
    w1_p = jnp.zeros((num_conds * dim_pad, H_pad), jnp.bfloat16)
    for c in range(num_conds):
        cos_rows = w1_bf[c * dim:c * dim + half]
        sin_rows = w1_bf[c * dim + half:(c + 1) * dim]
        w1_p = w1_p.at[c * dim_pad:c * dim_pad + half, :H].set(cos_rows)
        w1_p = w1_p.at[c * dim_pad + half_pad:
                       c * dim_pad + half_pad + half, :H].set(sin_rows)

    b1_p = jnp.zeros((1, H_pad), jnp.float32).at[:, :H].set(
        jnp.asarray(b1, jnp.float32).reshape(1, H))
    w2_p = jnp.zeros((H_pad, N_pad), jnp.bfloat16).at[:H, :H].set(
        jnp.asarray(w2, jnp.bfloat16))
    b2_p = jnp.zeros((1, N_pad), jnp.float32).at[:, :H].set(
        jnp.asarray(b2, jnp.float32).reshape(1, H))

    kernel = functools.partial(_timestep_embedder_kernel,
                               num_conds=num_conds, half_pad=half_pad)

    @jax.jit
    def forward(t):
        B, nc = t.shape
        assert nc == num_conds
        # Pad B to a multiple of 16 (bf16 sublane packing for the MXU LHS).
        B_pad = _round_up(max(B, 16), 16)
        TB = B_pad if B_pad <= _TB_MAX else _TB_MAX
        B_pad = _round_up(B_pad, TB)
        nb = B_pad // TB

        t_p = jnp.zeros((B_pad, nc), jnp.float32).at[:B].set(
            t.astype(jnp.float32))

        cost = pl.CostEstimate(
            flops=2 * B_pad * (num_conds * dim_pad * H_pad + H_pad * N_pad),
            transcendentals=B_pad * (num_conds * dim_pad + H_pad),
            bytes_accessed=(2 * (num_conds * dim_pad * H_pad + nb * H_pad * N_pad)
                            + 4 * (H_pad + N_pad + B_pad * nc + B_pad * N_pad)),
        )

        out_pad = pl.pallas_call(
            kernel,
            out_shape=jax.ShapeDtypeStruct((B_pad, N_pad), jnp.float32),
            grid=(nb, nt),
            in_specs=[
                pl.BlockSpec((TB, nc), lambda i, j: (i, 0)),                    # t
                pl.BlockSpec((1, half_pad), lambda i, j: (0, 0)),               # freqs
                pl.BlockSpec((num_conds * dim_pad, H_pad), lambda i, j: (0, 0)),# w1
                pl.BlockSpec((1, H_pad), lambda i, j: (0, 0)),                  # b1
                pl.BlockSpec((H_pad, tn), lambda i, j: (0, j)),                 # w2 tile
                pl.BlockSpec((1, tn), lambda i, j: (0, j)),                     # b2 tile
            ],
            out_specs=pl.BlockSpec((TB, tn), lambda i, j: (i, j)),
            scratch_shapes=[pltpu.VMEM((TB, H_pad), jnp.bfloat16)],
            compiler_params=pltpu.CompilerParams(
                dimension_semantics=("arbitrary", "arbitrary"),
                vmem_limit_bytes=_VMEM_LIMIT),
            cost_estimate=cost,
        )(t_p, freqs_p, w1_p, b1_p, w2_p, b2_p)

        return out_pad[:B, :H]

    return forward


def make_params(key, frequency_embedding_size, num_conds, hidden_size):
    """Deterministic synthetic parameters (shapes match the PyTorch module);
    weights bf16, biases f32; layout (in_features, out_features)."""
    k1, k2, k3, k4 = jax.random.split(key, 4)
    in_dim = frequency_embedding_size * num_conds
    w1 = (jax.random.normal(k1, (in_dim, hidden_size), jnp.float32) * 0.02
          ).astype(jnp.bfloat16)
    b1 = jax.random.normal(k2, (hidden_size,), jnp.float32) * 0.02
    w2 = (jax.random.normal(k3, (hidden_size, hidden_size), jnp.float32) * 0.02
          ).astype(jnp.bfloat16)
    b2 = jax.random.normal(k4, (hidden_size,), jnp.float32) * 0.02
    return w1, b1, w2, b2


def reference_forward(t, freqs, w1, b1, w2, b2):
    """Pure-JAX reference mirroring the PyTorch semantics (bf16 weights,
    f32 accumulation, matching the kernel's precision policy)."""
    args = jnp.einsum('bc,d->bcd', t.astype(jnp.float32),
                      freqs.astype(jnp.float32))
    emb = jnp.concatenate([jnp.cos(args), jnp.sin(args)], axis=-1)
    emb = emb.reshape(emb.shape[0], -1)      # (B, nc*dim); dim is even here
    h = jnp.dot(emb.astype(w1.dtype), w1,
                preferred_element_type=jnp.float32) + b1
    h = h * jax.nn.sigmoid(h)
    return jnp.dot(h.astype(w2.dtype), w2,
                   preferred_element_type=jnp.float32) + b2


if __name__ == "__main__":
    # Small shapes consistent with the module's forward.
    B = 2
    frequency_embedding_size = 256   # even -> no zero-pad branch
    num_conds = 1
    hidden_size = 32
    max_period = 10000.0

    key = jax.random.PRNGKey(0)
    k_t, k_p = jax.random.split(key)

    # Fractional timesteps, shape (B, num_conds).
    t = jax.random.uniform(k_t, (B, num_conds), jnp.float32) * 1000.0

    # freqs = exp(-log(max_period) * arange(half) / half).
    half = frequency_embedding_size // 2
    freqs = jnp.exp(
        -math.log(max_period) * jnp.arange(half, dtype=jnp.float32) / half)

    w1, b1, w2, b2 = make_params(k_p, frequency_embedding_size, num_conds,
                                 hidden_size)

    # One-time prep (weight padding / re-layout), then the hot-path call.
    embedder = make_timestep_embedder_fn(freqs, w1, b1, w2, b2,
                                         num_conds=num_conds)
    out = embedder(t)
    out = jax.block_until_ready(out)

    ref = reference_forward(t, freqs, w1, b1, w2, b2)
    assert out.shape == (B, hidden_size)
    assert jnp.allclose(out, ref, atol=1e-2, rtol=1e-2)

    print("KERNEL_OK")
</pallas_src>

<mosaic_0001>
module attributes {stable_mosaic.version = 11 : i64} {
  func.func @_timestep_embedder_kernel(%arg0: i32, %arg1: i32, %arg2: memref<16x1xf32, #tpu.memory_space<vmem>>, %arg3: memref<1x128xf32, #tpu.memory_space<vmem>>, %arg4: memref<256x128xbf16, #tpu.memory_space<vmem>>, %arg5: memref<1x128xf32, #tpu.memory_space<vmem>>, %arg6: memref<128x128xbf16, #tpu.memory_space<vmem>>, %arg7: memref<1x128xf32, #tpu.memory_space<vmem>>, %arg8: memref<16x128xf32, #tpu.memory_space<vmem>>, %arg9: memref<16x128xbf16, #tpu.memory_space<vmem>>) attributes {dimension_semantics = [#tpu.dimension_semantics<arbitrary>, #tpu.dimension_semantics<arbitrary>], iteration_bounds = array<i64: 1, 1>, scalar_prefetch = 0 : i64, scratch_operands = 1 : i64, tpu.core_type = #tpu.core_type<tc>, window_params = [{transform_indices = @transform_0, window_bounds = array<i64: 16, 1>}, {pipeline_mode = #tpu.pipeline_mode<synchronous>, transform_indices = @transform_1, window_bounds = array<i64: 1, 128>}, {pipeline_mode = #tpu.pipeline_mode<synchronous>, transform_indices = @transform_2, window_bounds = array<i64: 256, 128>}, {pipeline_mode = #tpu.pipeline_mode<synchronous>, transform_indices = @transform_3, window_bounds = array<i64: 1, 128>}, {transform_indices = @transform_4, window_bounds = array<i64: 128, 128>}, {transform_indices = @transform_5, window_bounds = array<i64: 1, 128>}, {transform_indices = @transform_6, window_bounds = array<i64: 16, 128>}]} {
    %c0_i32 = arith.constant 0 : i32
    %0 = arith.cmpi eq, %arg1, %c0_i32 : i32
    %1 = arith.extui %0 : i1 to i32
    %c0_i32_0 = arith.constant 0 : i32
    %2 = arith.cmpi ne, %1, %c0_i32_0 : i32
    scf.if %2 {
      %c0_8 = arith.constant 0 : index
      %c0_9 = arith.constant 0 : index
      %10 = vector.load %arg2[%c0_8, %c0_9] : memref<16x1xf32, #tpu.memory_space<vmem>>, vector<16x1xf32>
      %c0_10 = arith.constant 0 : index
      %c0_11 = arith.constant 0 : index
      %11 = vector.load %arg3[%c0_10, %c0_11] : memref<1x128xf32, #tpu.memory_space<vmem>>, vector<1x128xf32>
      %cst_12 = arith.constant 0.000000e+00 : f32
      %12 = vector.broadcast %cst_12 : f32 to vector<16x128xf32>
      %13 = vector.broadcast %10 : vector<16x1xf32> to vector<16x128xf32>
      %14 = vector.broadcast %11 : vector<1x128xf32> to vector<16x128xf32>
      %15 = arith.mulf %13, %14 : vector<16x128xf32>
      %16 = math.cos %15 : vector<16x128xf32>
      %17 = arith.truncf %16 : vector<16x128xf32> to vector<16x128xbf16>
      %c0_13 = arith.constant 0 : index
      %c0_14 = arith.constant 0 : index
      %18 = vector.load %arg4[%c0_13, %c0_14] : memref<256x128xbf16, #tpu.memory_space<vmem>>, vector<128x128xbf16>
      %cst_15 = arith.constant dense<0.000000e+00> : vector<16x128xf32>
      %19 = tpu.matmul %17, %18, %cst_15 {dimension_numbers = #tpu.dot_dimension_numbers<[1], [0], [0], [1], [0, 0, 1, 1], [], []>} : vector<16x128xbf16>, vector<128x128xbf16>, vector<16x128xf32> -> vector<16x128xf32>
      %20 = arith.addf %12, %19 : vector<16x128xf32>
      %21 = math.sin %15 : vector<16x128xf32>
      %22 = arith.truncf %21 : vector<16x128xf32> to vector<16x128xbf16>
      %c128 = arith.constant 128 : index
      %c0_16 = arith.constant 0 : index
      %23 = vector.load %arg4[%c128, %c0_16] : memref<256x128xbf16, #tpu.memory_space<vmem>>, vector<128x128xbf16>
      %cst_17 = arith.constant dense<0.000000e+00> : vector<16x128xf32>
      %24 = tpu.matmul %22, %23, %cst_17 {dimension_numbers = #tpu.dot_dimension_numbers<[1], [0], [0], [1], [0, 0, 1, 1], [], []>} : vector<16x128xbf16>, vector<128x128xbf16>, vector<16x128xf32> -> vector<16x128xf32>
      %25 = arith.addf %20, %24 : vector<16x128xf32>
      %c0_18 = arith.constant 0 : index
      %c0_19 = arith.constant 0 : index
      %26 = vector.load %arg5[%c0_18, %c0_19] : memref<1x128xf32, #tpu.memory_space<vmem>>, vector<1x128xf32>
      %27 = vector.broadcast %26 : vector<1x128xf32> to vector<16x128xf32>
      %28 = arith.addf %25, %27 : vector<16x128xf32>
      %29 = arith.negf %28 : vector<16x128xf32>
      %30 = math.exp %29 : vector<16x128xf32>
      %cst_20 = arith.constant 1.000000e+00 : f32
      %31 = vector.broadcast %cst_20 : f32 to vector<16x128xf32>
      %32 = arith.addf %31, %30 : vector<16x128xf32>
      %33 = arith.divf %31, %32 : vector<16x128xf32>
      %34 = arith.mulf %28, %33 : vector<16x128xf32>
      %35 = arith.truncf %34 : vector<16x128xf32> to vector<16x128xbf16>
      %c0_21 = arith.constant 0 : index
      %c0_22 = arith.constant 0 : index
      %36 = vector.load %arg9[%c0_21, %c0_22] : memref<16x128xbf16, #tpu.memory_space<vmem>>, vector<16x128xbf16>
      tpu.vector_store %arg9[%c0_21, %c0_22], %35 {strides = array<i32>} : memref<16x128xbf16, #tpu.memory_space<vmem>>, vector<16x128xbf16>,
    } else {
    }
    %c0 = arith.constant 0 : index
    %c0_1 = arith.constant 0 : index
    %3 = vector.load %arg9[%c0, %c0_1] : memref<16x128xbf16, #tpu.memory_space<vmem>>, vector<16x128xbf16>
    %c0_2 = arith.constant 0 : index
    %c0_3 = arith.constant 0 : index
    %4 = vector.load %arg6[%c0_2, %c0_3] : memref<128x128xbf16, #tpu.memory_space<vmem>>, vector<128x128xbf16>
    %cst = arith.constant dense<0.000000e+00> : vector<16x128xf32>
    %5 = tpu.matmul %3, %4, %cst {dimension_numbers = #tpu.dot_dimension_numbers<[1], [0], [0], [1], [0, 0, 1, 1], [], []>} : vector<16x128xbf16>, vector<128x128xbf16>, vector<16x128xf32> -> vector<16x128xf32>
    %c0_4 = arith.constant 0 : index
    %c0_5 = arith.constant 0 : index
    %6 = vector.load %arg7[%c0_4, %c0_5] : memref<1x128xf32, #tpu.memory_space<vmem>>, vector<1x128xf32>
    %7 = vector.broadcast %6 : vector<1x128xf32> to vector<16x128xf32>
    %8 = arith.addf %5, %7 : vector<16x128xf32>
    %c0_6 = arith.constant 0 : index
    %c0_7 = arith.constant 0 : index
    %9 = vector.load %arg8[%c0_6, %c0_7] : memref<16x128xf32, #tpu.memory_space<vmem>>, vector<16x128xf32>
    tpu.vector_store %arg8[%c0_6, %c0_7], %8 {strides = array<i32>} : memref<16x128xf32, #tpu.memory_space<vmem>>, vector<16x128xf32>,
    return
  }
  func.func @transform_0(%arg0: i32, %arg1: i32) -> (i32, i32) {
    %c0_i32 = arith.constant 0 : i32
    %c0_i32_0 = arith.constant 0 : i32
    return %arg0, %c0_i32 : i32, i32
  }
  func.func @transform_1(%arg0: i32, %arg1: i32) -> (i32, i32) {
    %c0_i32 = arith.constant 0 : i32
    %c0_i32_0 = arith.constant 0 : i32
    %c0_i32_1 = arith.constant 0 : i32
    return %c0_i32, %c0_i32_0 : i32, i32
  }
  func.func @transform_2(%arg0: i32, %arg1: i32) -> (i32, i32) {
    %c0_i32 = arith.constant 0 : i32
    %c0_i32_0 = arith.constant 0 : i32
    %c0_i32_1 = arith.constant 0 : i32
    return %c0_i32, %c0_i32_0 : i32, i32
  }
  func.func @transform_3(%arg0: i32, %arg1: i32) -> (i32, i32) {
    %c0_i32 = arith.constant 0 : i32
    %c0_i32_0 = arith.constant 0 : i32
    %c0_i32_1 = arith.constant 0 : i32
    return %c0_i32, %c0_i32_0 : i32, i32
  }
  func.func @transform_4(%arg0: i32, %arg1: i32) -> (i32, i32) {
    %c0_i32 = arith.constant 0 : i32
    %c0_i32_0 = arith.constant 0 : i32
    return %c0_i32, %arg1 : i32, i32
  }
  func.func @transform_5(%arg0: i32, %arg1: i32) -> (i32, i32) {
    %c0_i32 = arith.constant 0 : i32
    %c0_i32_0 = arith.constant 0 : i32
    return %c0_i32, %arg1 : i32, i32
  }
  func.func @transform_6(%arg0: i32, %arg1: i32) -> (i32, i32) {
    %c0_i32 = arith.constant 0 : i32
    return %arg0, %arg1 : i32, i32
  }
}

</mosaic_0001>

<bundles_post_ra>
// kernel: forward.1
= control target key start
LH: loop header
LB: loop body
LE: loop exit
PB: predicated region body
PF: predicated region fallthrough
CT: control target
= control target key end

     0   :  { %11 = vsyncpa [#allocation4], 0  ;;  %s1295_s0 = inlined_call_operand.vmem [shape: f32[16,1], index: 0, kind: input, shape index: {}]   ;;  %s1296_s1 = inlined_call_operand.vmem [shape: f32[1,128], index: 1, kind: input, shape index: {}]   ;;  %s1297_s2 = inlined_call_operand.hbm [shape: bf16[256,128], index: 2, kind: input, shape index: {}]   ;;  %s1298_s3 = inlined_call_operand.vmem [shape: f32[1,128], index: 3, kind: input, shape index: {}]   ;;  %s1299_s4 = inlined_call_operand.hbm [shape: bf16[128,128], index: 4, kind: input, shape index: {}]   ;;  %s1300_s5 = inlined_call_operand.vmem [shape: f32[1,128], index: 5, kind: input, shape index: {}]   ;;  %s1301_s6 = inlined_call_operand.vmem [shape: f32[16,128], index: 6, kind: output, shape index: {}]  }
   0x1   :  { %12 = vsyncpa [#allocation6], 0  ;;  %s1113_s21 = smov [#allocation3]  }
   0x2   :  { %s22_s22 = sshll.u32 %s1113_s21, 4  ;;  %s23_s22 = int_to_ptr.vmem [resolvable:$true] %s22_s22 }
   0x3   :  { %s1077_s23 = scalar_lea.vmem %s23_s22, 2048  ;;  %p1082_p1 = scmp.lt.s32.totalorder %s23_s22, %s23_s22 }
   0x4   :  { %p1078_p0 = scmp.ne.s32.totalorder %s23_s22, %s1077_s23  ;;  %p1083_p2 = scmp.lt.s32.totalorder %s1077_s23, %s1077_s23 }
   0x6   :  { %p1084_p3 = por %p1083_p2, %p1082_p1 }
   0x8   :  { %p1085_p4 = pnand %p1084_p3, %p1078_p0 }
   0xa   :  { %1088 = shalt.err (!%p1085_p4)
}
   0xb   :  { %s1114_s24 = smov 64   ;;  %s1115_s25 = smov 4  }
   0xc   :  { %28 = dma.hbm_to_vmem [thread:$0]  %s1297_s2, 2048, %s23_s22, [#allocation4], %s1114_s24, %s1114_s24, %s1115_s25  }
   0xd   :  { %s1116_s28 = smov [#allocation5]  }
   0xe   :  { %s36_s29 = sshll.u32 %s1116_s28, 4  ;;  %s37_s29 = int_to_ptr.vmem [resolvable:$true] %s36_s29 }
   0xf   :  { %s1097_s30 = scalar_lea.vmem %s37_s29, 1024  ;;  %p1102_p6 = scmp.lt.s32.totalorder %s37_s29, %s37_s29 }
  0x10   :  { %p1098_p5 = scmp.ne.s32.totalorder %s37_s29, %s1097_s30  ;;  %p1103_p7 = scmp.lt.s32.totalorder %s1097_s30, %s1097_s30 }
  0x12   :  { %p1104_p8 = por %p1103_p7, %p1102_p6 }
  0x14   :  { %p1105_p9 = pnand %p1104_p8, %p1098_p5 }
  0x16   :  { %1108 = shalt.err (!%p1105_p9)
}
  0x17   :  { %42 = dma.hbm_to_vmem [thread:$0]  %s1299_s4, 1024, %s37_s29, [#allocation6], %s1114_s24, %s1114_s24, %s1115_s25  }
  0x18   :  { %1109 = dma.done.wait [#allocation4], 2048  }
  0x19   :  { %1110 = vsyncadd [#allocation4], 4294965248 }
  0x1a   :  { %1111 = dma.done.wait [#allocation6], 1024  }
  0x1b   :  { %1112 = vsyncadd [#allocation6], 4294966272  ;;  %v1117_v0 = vmov 0   ;;  %v56_v1 = vld [vmem:[%s1295_s0] sm:$0xff]  ;;  %v57_v2 = vld [vmem:[%s1295_s0 + $0x8] sm:$0xff]  ;;  %v1118_v5 = vmov 0.0  }
  0x1c   :  { %1027 = vset.pattern.permute.xlu0 %v1117_v0  ;;  %v1028_v3 = vld [vmem:[#allocation3 + $0x78] sm:$0xff]   ;;  %946 = vmatprep.subr.bf16.mxu0 %v1118_v5  ;;  %v1030_v6 = vld [vmem:[#allocation3 + $0x70] sm:$0xff]   ;;  %v1032_v8 = vld [vmem:[#allocation3 + $0x68] sm:$0xff]   ;;  %vm1119_vm0 = vmmov 0   ;;  %v1120_v41 = vmov 683565275  }
  0x1d   :  { %61 = vperm.xlu0 %1027, %v56_v1   ;;  %v1029_v4 = vld [vmem:[#allocation3 + $0x38] sm:$0xff]   ;;  %966 = vmatprep.subr.bf16.mxu1 %v1118_v5  ;;  %v1031_v7 = vld [vmem:[#allocation3 + $0x30] sm:$0xff]   ;;  %v1033_v9 = vld [vmem:[#allocation3 + $0x28] sm:$0xff]   ;;  %v1121_v45 = vmov 2475754826  }
  0x1e   :  { %947 = vmatpush3.bf16.msra.mxu0 %v1028_v3  ;;  %967 = vmatpush3.bf16.msra.mxu1 %v1029_v4  ;;  %v1034_v10 = vld [vmem:[#allocation3 + $0x60] sm:$0xff]   ;;  %v1036_v12 = vld [vmem:[#allocation3 + $0x58] sm:$0xff]   ;;  %v1038_v14 = vld [vmem:[#allocation3 + $0x50] sm:$0xff]   ;;  %v1122_v47 = vmov 2131351028  }
  0x1f   :  { %948 = vmatprep.subr.bf16.mxu0 %v1118_v5  ;;  %968 = vmatprep.subr.bf16.mxu1 %v1118_v5  ;;  %v1035_v11 = vld [vmem:[#allocation3 + $0x20] sm:$0xff]   ;;  %v1037_v13 = vld [vmem:[#allocation3 + $0x18] sm:$0xff]   ;;  %v1039_v15 = vld [vmem:[#allocation3 + $0x10] sm:$0xff]   ;;  %v1123_v49 = vmov 2102212464  }
  0x20   :  { %962 = vmatprep.mubr.msk.bf16.mxu0 %vm1119_vm0, %v1118_v5  ;;  %982 = vmatprep.mubr.msk.bf16.mxu1 %vm1119_vm0, %v1118_v5  ;;  %v1040_v16 = vld [vmem:[#allocation3 + $0x48] sm:$0xff]   ;;  %v1042_v18 = vld [vmem:[#allocation3 + $0x40] sm:$0xff]   ;;  %v864_v20 = vld [vmem:[%s1296_s1] ss:$0 sm:$0xff]  ;;  %v1124_v51 = vmov 920167782  }
  0x21   :  { %66 = vperm.xlu0 %1027, %v57_v2   ;;  %v1041_v17 = vld [vmem:[#allocation3 + $0x8] sm:$0xff]   ;;  %v1043_v19 = vld [vmem:[#allocation3] sm:$0xff]   ;;  %v1125_v58 = vmov 1326507024  }
  0x22   :  { %949 = vmatpush3.bf16.msra.mxu0 %v1030_v6  ;;  %969 = vmatpush3.bf16.msra.mxu1 %v1031_v7 }
  0x23   :  { %950 = vmatprep.subr.bf16.mxu0 %v1118_v5  ;;  %970 = vmatprep.subr.bf16.mxu1 %v1118_v5 }
  0x26   :  { %951 = vmatpush3.bf16.msra.mxu0 %v1032_v8  ;;  %971 = vmatpush3.bf16.msra.mxu1 %v1033_v9 }
  0x27   :  { %952 = vmatprep.subr.bf16.mxu0 %v1118_v5  ;;  %972 = vmatprep.subr.bf16.mxu1 %v1118_v5 }
  0x2a   :  { %953 = vmatpush3.bf16.msra.mxu0 %v1034_v10  ;;  %973 = vmatpush3.bf16.msra.mxu1 %v1035_v11 }
  0x2b   :  { %954 = vmatprep.subr.bf16.mxu0 %v1118_v5  ;;  %974 = vmatprep.subr.bf16.mxu1 %v1118_v5 }
  0x2e   :  { %955 = vmatpush3.bf16.msra.mxu0 %v1036_v12  ;;  %975 = vmatpush3.bf16.msra.mxu1 %v1037_v13 }
  0x2f   :  { %956 = vmatprep.subr.bf16.mxu0 %v1118_v5  ;;  %976 = vmatprep.subr.bf16.mxu1 %v1118_v5 }
  0x32   :  { %957 = vmatpush3.bf16.msra.mxu0 %v1038_v14  ;;  %977 = vmatpush3.bf16.msra.mxu1 %v1039_v15 }
  0x33   :  { %958 = vmatprep.subr.bf16.mxu0 %v1118_v5  ;;  %978 = vmatprep.subr.bf16.mxu1 %v1118_v5 }
  0x36   :  { %959 = vmatpush3.bf16.msra.mxu0 %v1040_v16  ;;  %979 = vmatpush3.bf16.msra.mxu1 %v1041_v17 }
  0x37   :  { %960 = vmatprep.subr.bf16.mxu0 %v1118_v5  ;;  %980 = vmatprep.subr.bf16.mxu1 %v1118_v5 }
  0x3a   :  { %961 = vmatpush3.bf16.msra.mxu0 %v1042_v18  ;;  %981 = vmatpush3.bf16.msra.mxu1 %v1043_v19 }
  0x3b   :  { %986 = vmatprep.subr.bf16.mxu0 %v1118_v5 }
  0x98   :  { %v62_v21 = vpop.permute.xlu0 %61 }
  0x99   :  { %v1197_v22 = vmul.f32 %v864_v20, %v62_v21 }
  0x9b   :  { %v77_v23 = vand.u32 2147483647, %v1197_v22  ;;  %v80_v24 = vand.u32 2139095040, %v1197_v22  ;;  %vm79_vm15 = vcmp.lt.s32.totalorder %v1197_v22, 0 }
  0x9c   :  { %v67_v25 = vpop.permute.xlu0 %66 }
  0x9d   :  { %v81_v26 = vshrl.u32 %v80_v24, 23  ;;  %v1201_v27 = vmul.f32 %v864_v20, %v67_v25  ;;  %v84_v28 = vand.u32 8388607, %v77_v23 }
  0x9f   :  { %v865_v29 = vadd.s32 4294967169, %v81_v26  ;;  %v183_v30 = vand.u32 2139095040, %v1201_v27  ;;  %v85_v32 = vor.u32 8388608, %v84_v28  ;;  %v180_v34 = vand.u32 2147483647, %v1201_v27 }
  0xa1   :  { %v87_v31 = vadd.s32 1, %v865_v29  ;;  %v184_v33 = vshrl.u32 %v183_v30, 23  ;;  %v1207_v39 = vshll.u32 %v85_v32, 8  ;;  %v187_v43 = vand.u32 8388607, %v180_v34 }
  0xa3   :  { %vm88_vm1 = vcmp.gt.s32.totalorder %v87_v31, 0  ;;  %v869_v36 = vadd.s32 4294967169, %v184_v33  ;;  %v188_v10 = vor.u32 8388608, %v187_v43 }
  0xa4   :  { %v89_v35 = vsel %vm88_vm1, %v87_v31, 0  ;;  %vm1255_vm1 = vcmp.le.f32.partialorder %v77_v23, 0.7853982 }
  0xa5   :  { %v90_v37 = vshrl.u32 %v89_v35, 5  ;;  %v91_v38 = vand.u32 31, %v89_v35  ;;  %v190_v44 = vadd.s32 1, %v869_v36  ;;  %v228_v25 = vshll.u32 %v188_v10, 8 }
  0xa7   :  { %v92_v40 = vsub.s32 32, %v91_v38  ;;  %v94_v42 = vshll.u32 %v1120_v41, %v91_v38  ;;  %v97_v46 = vshll.u32 %v1121_v45, %v91_v38  ;;  %v100_v48 = vshll.u32 %v1122_v47, %v91_v38 }
  0xa8   :  { %v103_v50 = vshll.u32 %v1123_v49, %v91_v38  ;;  %v106_v52 = vshll.u32 %v1124_v51, %v91_v38  ;;  %vm109_vm2 = vcmp.lt.s32.totalorder %v90_v37, 1  ;;  %vm111_vm3 = vcmp.lt.s32.totalorder %v90_v37, 3 }
  0xa9   :  { %v95_v53 = vshrl.u32 %v1121_v45, %v92_v40  ;;  %v98_v54 = vshrl.u32 %v1122_v47, %v92_v40  ;;  %v101_v55 = vshrl.u32 %v1123_v49, %v92_v40  ;;  %v93_v56 = vshrl.u32 %v1120_v41, %v92_v40 }
  0xaa   :  { %v104_v57 = vshrl.u32 %v1124_v51, %v92_v40  ;;  %v107_v59 = vshrl.u32 %v1125_v58, %v92_v40  ;;  %vm191_vm4 = vcmp.gt.s32.totalorder %v190_v44, 0  ;;  %vm112_vm5 = vcmp.lt.s32.totalorder %v90_v37, 4 }
  0xab   :  { %v96_v60 = vor.u32 %v95_v53, %v94_v42  ;;  %v99_v61 = vor.u32 %v98_v54, %v97_v46  ;;  %v102_v62 = vor.u32 %v101_v55, %v100_v48  ;;  %v192_v1 = vsel %vm191_vm4, %v190_v44, 0 }
  0xac   :  { %v105_v63 = vor.u32 %v104_v57, %v103_v50  ;;  %v108_v0 = vor.u32 %v107_v59, %v106_v52  ;;  %vm110_vm6 = vcmp.lt.s32.totalorder %v90_v37, 2  ;;  %v194_v13 = vand.u32 31, %v192_v1 }
  0xad   :  { %v113_v2 = vsel %vm109_vm2, %v93_v56, %v96_v60  ;;  %v114_v3 = vsel %vm112_vm5, %v102_v62, 2102212464  ;;  %v117_v4 = vsel %vm109_vm2, %v96_v60, %v99_v61  ;;  %v121_v6 = vsel %vm109_vm2, %v99_v61, %v102_v62 }
  0xae   :  { %v115_v7 = vsel %vm111_vm3, %v99_v61, %v114_v3  ;;  %v118_v8 = vsel %vm112_vm5, %v105_v63, 920167782  ;;  %v122_v9 = vsel %vm112_vm5, %v108_v0, 1326507024  ;;  %v193_v21 = vshrl.u32 %v192_v1, 5 }
  0xaf   :  { %v119_v11 = vsel %vm111_vm3, %v102_v62, %v118_v8  ;;  %v123_v12 = vsel %vm111_vm3, %v105_v63, %v122_v9  ;;  %v116_v14 = vsel %vm110_vm6, %v113_v2, %v115_v7  ;;  %v195_v24 = vsub.s32 32, %v194_v13 }
  0xb0   :  { %v120_v15 = vsel %vm110_vm6, %v117_v4, %v119_v11  ;;  %v124_v16 = vsel %vm110_vm6, %v121_v6, %v123_v12  ;;  %v132_v26 = vmul.u32 %v1207_v39, %v116_v14  ;;  %v197_v28 = vshll.u32 %v1120_v41, %v194_v13 }
  0xb1   :  { %v1220_v17 = vmul.u32.u64.low %v1207_v39, %v124_v16  ;;  %v1221_v18 = vmul.u32.u64.high %v1207_v39, %v124_v16, %v1220_v17  ;;  %v1224_v19 = vmul.u32.u64.low %v1207_v39, %v120_v15  ;;  %v1225_v20 = vmul.u32.u64.high %v1207_v39, %v120_v15, %v1224_v19 }
  0xb2   :  { %v200_v29 = vshll.u32 %v1121_v45, %v194_v13  ;;  %v203_v30 = vshll.u32 %v1122_v47, %v194_v13  ;;  %v198_v31 = vshrl.u32 %v1121_v45, %v195_v24  ;;  %v201_v32 = vshrl.u32 %v1122_v47, %v195_v24 }
  0xb3   :  { %v204_v33 = vshrl.u32 %v1123_v49, %v195_v24  ;;  %v206_v35 = vshll.u32 %v1123_v49, %v194_v13  ;;  %vm134_vm7 = vc.u32 %v1221_v18, %v1224_v19  ;;  %v135_v36 = vadd.s32 1, %v1225_v20 }
  0xb4   :  { %v207_v37 = vshrl.u32 %v1124_v51, %v195_v24  ;;  %v209_v38 = vshll.u32 %v1124_v51, %v194_v13  ;;  %v199_v40 = vor.u32 %v198_v31, %v197_v28  ;;  %v202_v42 = vor.u32 %v201_v32, %v200_v29 }
  0xb5   :  { %v205_v43 = vor.u32 %v204_v33, %v203_v30  ;;  %v210_v44 = vshrl.u32 %v1125_v58, %v195_v24  ;;  %v136_v39 = vsel %vm134_vm7, %v135_v36, %v1225_v20  ;;  %vm212_vm8 = vcmp.lt.s32.totalorder %v193_v21, 1 }
  0xb6   :  { %v208_v46 = vor.u32 %v207_v37, %v206_v35  ;;  %vm215_vm9 = vcmp.lt.s32.totalorder %v193_v21, 4  ;;  %v137_v45 = vadd.s32 %v136_v39, %v132_v26  ;;  %vm214_vm10 = vcmp.lt.s32.totalorder %v193_v21, 3 }
  0xb7   :  { %v211_v47 = vor.u32 %v210_v44, %v209_v38  ;;  %v217_v48 = vsel %vm215_vm9, %v205_v43, 2102212464  ;;  %v196_v49 = vshrl.u32 %v1120_v41, %v195_v24  ;;  %v220_v50 = vsel %vm212_vm8, %v199_v40, %v202_v42 }
  0xb8   :  { %v221_v52 = vsel %vm215_vm9, %v208_v46, 920167782  ;;  %v224_v53 = vsel %vm212_vm8, %v202_v42, %v205_v43  ;;  %v138_v54 = vadd.s32 536870912, %v137_v45  ;;  %vm213_vm11 = vcmp.lt.s32.totalorder %v193_v21, 2 }
  0xb9   :  { %v222_v51 = vsel %vm214_vm10, %v205_v43, %v221_v52  ;;  %v225_v55 = vsel %vm215_vm9, %v211_v47, 1326507024  ;;  %v216_v56 = vsel %vm212_vm8, %v196_v49, %v199_v40  ;;  %v218_v57 = vsel %vm214_vm10, %v202_v42, %v217_v48 }
  0xba   :  { %v223_v58 = vsel %vm213_vm11, %v220_v50, %v222_v51  ;;  %v226_v59 = vsel %vm214_vm10, %v208_v46, %v225_v55  ;;  %v1235_v60 = vshrl.u32 %v138_v54, 30  ;;  %v219_v2 = vsel %vm213_vm11, %v216_v56, %v218_v57 }
  0xbb   :  { %v227_v61 = vsel %vm213_vm11, %v224_v53, %v226_v59  ;;  %v1237_v62 = vmul.u32.u64.low %v228_v25, %v223_v58  ;;  %v1238_v63 = vmul.u32.u64.high %v228_v25, %v223_v58, %v1237_v62  ;;  %v235_v6 = vmul.u32 %v228_v25, %v219_v2 }
  0xbc   :  { %v1240_v0 = vmul.u32.u64.low %v228_v25, %v227_v61  ;;  %v1241_v1 = vmul.u32.u64.high %v228_v25, %v227_v61, %v1240_v0  ;;  %v140_v41 = vshll.u32 %v1235_v60, 30  ;;  %v133_v20 = vadd.s32 %v1224_v19, %v1221_v18 }
  0xbd   :  { %v238_v4 = vadd.s32 1, %v1238_v63  ;;  %v163_v56 = vsub.s32 4, %v1235_v60  ;;  %vm182_vm2 = vcmp.lt.s32.totalorder %v1201_v27, 0  ;;  %vm181_vm3 = vcmp.le.f32.partialorder %v180_v34, 0.7853982 }
  0xbe   :  { %v141_v3 = vsub.s32 %v137_v45, %v140_v41  ;;  %vm237_vm12 = vc.u32 %v1241_v1, %v1237_v62  ;;  %v236_v43 = vadd.s32 %v1237_v62, %v1241_v1 }
  0xbf   :  { %v239_v8 = vsel %vm237_vm12, %v238_v4, %v1238_v63  ;;  %v164_v59 = vsel %vm79_vm15, %v163_v56, %v1235_v60 }
  0xc0   :  { %v143_v7 = vsub.s32 0, %v141_v3  ;;  %v240_v9 = vadd.s32 %v239_v8, %v235_v6  ;;  %v166_v62 = vsel %vm1255_vm1, 0, %v164_v59 }
  0xc1   :  { %v393_v1 = vadd.s32 3, %v166_v62  ;;  %v170_v34 = vand.u32 3, %v166_v62 }
  0xc2   :  { %v866_v10 = vmin.u32 %v143_v7, %v141_v3  ;;  %v241_v11 = vadd.s32 536870912, %v240_v9 }
  0xc3   :  { %v394_v4 = vand.u32 3, %v393_v1  ;;  %vm172_vm6 = vcmp.eq.s32.totalorder %v170_v34, 0  ;;  %vm175_vm7 = vcmp.eq.s32.totalorder %v170_v34, 2  ;;  %vm171_vm9 = vcmp.lt.s32.totalorder %v170_v34, 2 }
  0xc4   :  { %v145_v12 = vclz %v866_v10  ;;  %v242_v13 = vshrl.u32 %v241_v11, 30 }
  0xc5   :  { %vm396_vm4 = vcmp.eq.s32.totalorder %v394_v4, 0  ;;  %vm399_vm5 = vcmp.eq.s32.totalorder %v394_v4, 2  ;;  %vm395_vm8 = vcmp.lt.s32.totalorder %v394_v4, 2 }
  0xc6   :  { %v867_v14 = vadd.s32 4294967294, %v145_v12  ;;  %v243_v15 = vshll.u32 %v242_v13, 30  ;;  %v266_v23 = vsub.s32 4, %v242_v13 }
  0xc8   :  { %vm868_vm13 = vcmp.lt.s32.totalorder %v867_v14, 0  ;;  %v244_v17 = vsub.s32 %v240_v9, %v243_v15  ;;  %v267_v63 = vsel %vm182_vm2, %v266_v23, %v242_v13 }
  0xc9   :  { %v148_v16 = vsel %vm868_vm13, 0, %v867_v14  ;;  %v269_v0 = vsel %vm181_vm3, 0, %v267_v63 }
  0xca   :  { %v149_v21 = vsub.s32 32, %v148_v16  ;;  %v153_v24 = vsub.s32 4294967266, %v148_v16  ;;  %v246_v25 = vsub.s32 0, %v244_v17  ;;  %v150_v26 = vshll.u32 %v141_v3, %v148_v16 }
  0xcb   :  { %v497_v3 = vadd.s32 3, %v269_v0  ;;  %v273_v8 = vand.u32 3, %v269_v0 }
  0xcc   :  { %v151_v28 = vshrl.u32 %v133_v20, %v149_v21  ;;  %v154_v29 = vadd.s32 127, %v153_v24  ;;  %v870_v30 = vmin.u32 %v246_v25, %v244_v17 }
  0xcd   :  { %v498_v9 = vand.u32 3, %v497_v3  ;;  %vm275_vm10 = vcmp.eq.s32.totalorder %v273_v8, 0  ;;  %vm278_vm13 = vcmp.eq.s32.totalorder %v273_v8, 2 }
  0xce   :  { %v152_v31 = vor.u32 %v151_v28, %v150_v26  ;;  %v155_v32 = vshll.u32 %v154_v29, 23  ;;  %v248_v33 = vclz %v870_v30 }
  0xcf   :  { %vm500_vm11 = vcmp.eq.s32.totalorder %v498_v9, 0  ;;  %vm503_vm12 = vcmp.eq.s32.totalorder %v498_v9, 2 }
  0xd0   :  { %v156_v35 = vor.u32 4788187, %v155_v32  ;;  %v871_v36 = vadd.s32 4294967294, %v248_v33  ;;  %v159_v38 = vcvt.s32.f32 %v152_v31 }
  0xd2   :  { %v157_v37 = vand.u32 2147483647, %v156_v35  ;;  %vm872_vm14 = vcmp.lt.s32.totalorder %v871_v36, 0 }
  0xd3   :  { %v251_v42 = vsel %vm872_vm14, 0, %v871_v36  ;;  %vm499_vm14 = vcmp.lt.s32.totalorder %v498_v9, 2 }
  0xd4   :  { %v160_v40 = vmul.f32 %v159_v38, %v157_v37  ;;  %v252_v18 = vsub.s32 32, %v251_v42  ;;  %v256_v19 = vsub.s32 4294967266, %v251_v42  ;;  %v253_v39 = vshll.u32 %v244_v17, %v251_v42  ;;  %v1044_v37 = vld [vmem:[#allocation5 + $0x38] sm:$0xff]   ;;  %v1047_v38 = vld [vmem:[#allocation5 + $0x20] sm:$0xff]   ;;  %v1049_v42 = vld [vmem:[#allocation5 + $0x10] sm:$0xff]  }
  0xd6   :  { %v161_v44 = vxor.u32 2147483648, %v160_v40  ;;  %v254_v46 = vshrl.u32 %v236_v43, %v252_v18  ;;  %v257_v45 = vadd.s32 127, %v256_v19  ;;  %v1050_v43 = vld [vmem:[#allocation5 + $0x8] sm:$0xff]   ;;  %v1051_v18 = vld [vmem:[#allocation5] sm:$0xff]  }
  0xd8   :  { %v162_v47 = vsel %vm79_vm15, %v161_v44, %v160_v40  ;;  %v255_v49 = vor.u32 %v254_v46, %v253_v39  ;;  %v258_v50 = vshll.u32 %v257_v45, 23  ;;  %vm274_vm15 = vcmp.lt.s32.totalorder %v273_v8, 2  ;;  %v1048_v40 = vld [vmem:[#allocation5 + $0x18] sm:$0xff]  }
  0xd9   :  { %v165_v52 = vsel %vm1255_vm1, %v1197_v22, %v162_v47  ;;  %vm169_vm1 = vweird.f32 %v1197_v22  ;;  %v1045_v22 = vld [vmem:[#allocation5 + $0x30] sm:$0xff]   ;;  %v897_v39 = vld [vmem:[%s1298_s3] ss:$0 sm:$0xff] }
  0xda   :  { %v259_v53 = vor.u32 4788187, %v258_v50  ;;  %1053 = vcosq.f32 %v165_v52  ;;  %v262_v51 = vcvt.s32.f32 %v255_v49 }
  0xdb   :  { %1055 = vsinq.f32 %v165_v52 }
  0xdc   :  { %v260_v54 = vand.u32 2147483647, %v259_v53 }
  0xde   :  { %v263_v55 = vmul.f32 %v262_v51, %v260_v54 }
  0xe0   :  { %v264_v57 = vxor.u32 2147483648, %v263_v55 }
  0xe2   :  { %v265_v58 = vsel %vm182_vm2, %v264_v57, %v263_v55  ;;  %vm272_vm2 = vweird.f32 %v1201_v27 }
  0xe3   :  { %v268_v61 = vsel %vm181_vm3, %v1201_v27, %v265_v58  ;;  %v1046_v27 = vld [vmem:[#allocation5 + $0x28] sm:$0xff]  }
  0xe4   :  { %1057 = vcosq.f32 %v268_v61 }
  0xe5   :  { %1059 = vsinq.f32 %v268_v61 }
  0xe7   :  { %v1054_v41 = vpop.eup %1053 }
  0xe8   :  { %v1056_v2 = vpop.eup %1055  ;;  %v176_v7 = vxor.u32 2147483648, %v1054_v41 }
  0xe9   :  { %v173_v6 = vxor.u32 2147483648, %v1056_v2 }
  0xea   :  { %v401_v11 = vsel %vm399_vm5, %v176_v7, %v1056_v2  ;;  %v177_v13 = vsel %vm175_vm7, %v176_v7, %v1056_v2 }
  0xeb   :  { %v398_v10 = vsel %vm396_vm4, %v1054_v41, %v173_v6  ;;  %v174_v12 = vsel %vm172_vm6, %v1054_v41, %v173_v6  ;;  %v902_v41 = vld [vmem:[%s1300_s5] ss:$0 sm:$0xff] }
  0xec   :  { %v402_v17 = vsel %vm395_vm8, %v398_v10, %v401_v11  ;;  %v178_v21 = vsel %vm171_vm9, %v174_v12, %v177_v13 }
  0xed   :  { %v403_v30 = vsel %vm169_vm1, nan, %v402_v17  ;;  %v179_v32 = vsel %vm169_vm1, nan, %v178_v21 }
  0xf1   :  { %v1058_v60 = vpop.eup %1057 }
  0xf2   :  { %v1060_v14 = vpop.eup %1059  ;;  %v279_v15 = vxor.u32 2147483648, %v1058_v60 }
  0xf3   :  { %v276_v16 = vxor.u32 2147483648, %v1060_v14 }
  0xf4   :  { %v505_v20 = vsel %vm503_vm12, %v279_v15, %v1060_v14  ;;  %v280_v24 = vsel %vm278_vm13, %v279_v15, %v1060_v14 }
  0xf5   :  { %v502_v25 = vsel %vm500_vm11, %v1058_v60, %v276_v16  ;;  %v277_v26 = vsel %vm275_vm10, %v1058_v60, %v276_v16 }
  0xf6   :  { %v506_v28 = vsel %vm499_vm14, %v502_v25, %v505_v20  ;;  %v281_v29 = vsel %vm274_vm15, %v277_v26, %v280_v24 }
  0xf7   :  { %v507_v31 = vsel %vm272_vm2, nan, %v506_v28  ;;  %v282_v33 = vsel %vm272_vm2, nan, %v281_v29 }
  0xf8   :  { %v508_v35 = vpack.c.bf16 %v507_v31, %v403_v30  ;;  %v283_v36 = vpack.c.bf16 %v282_v33, %v179_v32 }
  0xfa   :  { %963 = vmatmul.mubr.bf16.vlgmr.msra.gmra.mxu0 %v508_v35  ;;  %983 = vmatmul.mubr.bf16.vlgmr.msra.gmra.mxu1 %v283_v36 }
  0xfb   :  { %1002 = vmatprep.mubr.msk.bf16.mxu0 %vm1119_vm0, %v1118_v5  ;;  %987 = vmatpush3.bf16.msra.mxu0 %v1044_v37 }
  0xfc   :  { %988 = vmatprep.subr.bf16.mxu0 %v1118_v5 }
  0xff   :  { %989 = vmatpush3.bf16.msra.mxu0 %v1045_v22 }
 0x100   :  { %990 = vmatprep.subr.bf16.mxu0 %v1118_v5 }
 0x103   :  { %991 = vmatpush3.bf16.msra.mxu0 %v1046_v27 }
 0x104   :  { %992 = vmatprep.subr.bf16.mxu0 %v1118_v5 }
 0x107   :  { %993 = vmatpush3.bf16.msra.mxu0 %v1047_v38 }
 0x108   :  { %994 = vmatprep.subr.bf16.mxu0 %v1118_v5 }
 0x10b   :  { %995 = vmatpush3.bf16.msra.mxu0 %v1048_v40 }
 0x10c   :  { %996 = vmatprep.subr.bf16.mxu0 %v1118_v5 }
 0x10f   :  { %997 = vmatpush3.bf16.msra.mxu0 %v1049_v42 }
 0x110   :  { %998 = vmatprep.subr.bf16.mxu0 %v1118_v5 }
 0x113   :  { %999 = vmatpush3.bf16.msra.mxu0 %v1050_v43 }
 0x114   :  { %1000 = vmatprep.subr.bf16.mxu0 %v1118_v5 }
 0x117   :  { %1001 = vmatpush3.bf16.msra.mxu0 %v1051_v18 }
 0x1ba   :  { %v607_v19 = vpop.f32.mrf.mxu0  ;;  %v696_v44 = vpop.f32.mrf.mxu1 }
 0x1bb   :  { %v697_v46 = vadd.f32 %v696_v44, %v607_v19 }
 0x1bc   :  { %v964_v45 = vpop.f32.mrf.mxu0  ;;  %v984_v47 = vpop.f32.mrf.mxu1 }
 0x1bd   :  { %v710_v48 = vadd.f32 %v897_v39, %v697_v46 }
 0x1be   :  { %v610_v49 = vpop.f32.mrf.mxu0  ;;  %v699_v50 = vpop.f32.mrf.mxu1 }
 0x1bf   :  { %v898_v52 = vmul.f32 -1.442695, %v710_v48  ;;  %v700_v53 = vadd.f32 %v699_v50, %v610_v49 }
 0x1c0   :  { %v965_v54 = vpop.f32.mrf.mxu0  ;;  %v985_v51 = vpop.f32.mrf.mxu1 }
 0x1c1   :  { %1061 = vpow2.f32 %v898_v52  ;;  %v711_v55 = vadd.f32 %v897_v39, %v700_v53 }
 0x1c3   :  { %v899_v5 = vmul.f32 -1.442695, %v711_v55 }
 0x1c5   :  { %1063 = vpow2.f32 %v899_v5 }
 0x1ce   :  { %v1062_v56 = vpop.eup %1061 }
 0x1cf   :  { %v718_v57 = vadd.f32 1.0, %v1062_v56 }
 0x1d1   :  { %1065 = vrcp.f32 %v718_v57 }
 0x1d2   :  { %v1064_v23 = vpop.eup %1063 }
 0x1d3   :  { %v719_v58 = vadd.f32 1.0, %v1064_v23 }
 0x1d5   :  { %1067 = vrcp.f32 %v719_v58 }
 0x1de   :  { %v1066_v59 = vpop.eup %1065 }
 0x1df   :  { %v724_v62 = vmul.f32 %v1066_v59, %v710_v48 }
 0x1e2   :  { %v1068_v61 = vpop.eup %1067 }
 0x1e3   :  { %v725_v63 = vmul.f32 %v1068_v61, %v711_v55 }
 0x1e5   :  { %v917_v0 = vpack.c.bf16 %v725_v63, %v724_v62 }
 0x1e7   :  { %918 = vst [vmem:[#allocation2] sm:$0xff] %v917_v0  }
 0x1ee   :  { %v1052_v1 = vld [vmem:[#allocation2] sm:$0xff]  }
 0x1ef   :  { %1003 = vmatmul.mubr.bf16.vlgmr.msra.gmra.mxu0 %v1052_v1 }
 0x2af   :  { %v849_v2 = vpop.f32.mrf.mxu0 }
 0x2b0   :  { %v850_v3 = vadd.f32 %v902_v41, %v849_v2 }
 0x2b1   :  { %v1004_v4 = vpop.f32.mrf.mxu0 }
 0x2b2   :  { %856 = vst [vmem:[%s1301_s6] sm:$0xff] %v850_v3 }
 0x2b3   :  { %v852_v34 = vpop.f32.mrf.mxu0 }
 0x2b4   :  { %v853_v6 = vadd.f32 %v902_v41, %v852_v34 }
 0x2b5   :  { %v1005_v7 = vpop.f32.mrf.mxu0 }
 0x2b6   :  { %857 = vst [vmem:[%s1301_s6 + $0x8] sm:$0xff] %v853_v6 }
 0x2b7   :  { %862 = vsyncpa [#allocation4], 1 }
 0x2b8   :  { %863 = vsyncpa [#allocation6], 1 }

</bundles_post_ra>
